<compile_context>
chip_gen: v5e
topology: v5e:2x2
jax: 0.10.0
libtpu: 0.0.40
codegen_flags: <defaults>
</compile_context>

<pallas_src>
import jax
import jax.numpy as jnp
from jax.experimental import pallas as pl
from jax.experimental.pallas import tpu as pltpu

LANE = 128  # TPU vreg lane width


def _round_up(n, m):
    return ((n + m - 1) // m) * m


def mlp_kernel(x_ref,
               w1_ref, b1_ref,
               w2_ref, b2_ref,
               w3_ref, b3_ref,
               w4_ref, b4_ref,
               o_ref):
    """4-layer MLP forward on one batch tile; everything VMEM-resident.

    Dots run in the weights' dtype (bf16) with f32 accumulation; bias-add and
    ReLU stay f32 (v5e-friendly), activations are cast back just before the
    next dot.
    """
    h = jnp.dot(x_ref[...], w1_ref[...],
                preferred_element_type=jnp.float32) + b1_ref[...]
    h = jnp.maximum(h, 0.0)

    h = jnp.dot(h.astype(w2_ref.dtype), w2_ref[...],
                preferred_element_type=jnp.float32) + b2_ref[...]
    h = jnp.maximum(h, 0.0)

    h = jnp.dot(h.astype(w3_ref.dtype), w3_ref[...],
                preferred_element_type=jnp.float32) + b3_ref[...]
    h = jnp.maximum(h, 0.0)

    y = jnp.dot(h.astype(w4_ref.dtype), w4_ref[...],
                preferred_element_type=jnp.float32) + b4_ref[...]
    o_ref[...] = y.astype(o_ref.dtype)


def init_params(key, obs_size, hidden_size, n_actions):
    """f32 params mimicking nn.Linear's uniform(+/- 1/sqrt(fan_in)) init.

    Weights stored [in, out] (transposed vs. torch's [out, in]); biases [1, out].
    """
    dims = [(obs_size, hidden_size),
            (hidden_size, hidden_size),
            (hidden_size, hidden_size),
            (hidden_size, n_actions)]
    params = {}
    for i, (fan_in, fan_out) in enumerate(dims, start=1):
        key, kw, kb = jax.random.split(key, 3)
        bound = 1.0 / (fan_in ** 0.5)
        params[f"w{i}"] = jax.random.uniform(
            kw, (fan_in, fan_out), jnp.float32, -bound, bound)
        params[f"b{i}"] = jax.random.uniform(
            kb, (1, fan_out), jnp.float32, -bound, bound)
    return params


def prepare_params(params, compute_dtype=jnp.bfloat16):
    """Zero-pad every feature dim to a multiple of 128 lanes; cast weights to
    the matmul compute dtype (biases stay f32).  Zero padding keeps the math
    exact."""
    prepared = {}
    for i in (1, 2, 3, 4):
        w = params[f"w{i}"]
        b = params[f"b{i}"]
        fi, fo = w.shape
        fip, fop = _round_up(fi, LANE), _round_up(fo, LANE)
        prepared[f"w{i}"] = jnp.pad(
            w, ((0, fip - fi), (0, fop - fo))).astype(compute_dtype)
        prepared[f"b{i}"] = jnp.pad(
            b, ((0, 0), (0, fop - fo))).astype(jnp.float32)
    return prepared


def net_forward(x, params, *, batch_tile=256, compute_dtype=jnp.bfloat16):
    """Forward pass of `Net`: x [batch, obs_size] f32 -> [batch, n_actions] f32."""
    batch, obs = x.shape
    n_actions = params["w4"].shape[1]

    # In a real RL loop prepare_params() should be done once, outside the step.
    p = prepare_params(params, compute_dtype)
    obs_p = p["w1"].shape[0]
    act_p = p["w4"].shape[1]

    xp = jnp.pad(x, ((0, 0), (0, obs_p - obs))).astype(compute_dtype)

    operands = (xp,
                p["w1"], p["b1"], p["w2"], p["b2"],
                p["w3"], p["b3"], p["w4"], p["b4"])
    out_shape = jax.ShapeDtypeStruct((batch, act_p), jnp.float32)

    num_tiles = pl.cdiv(batch, batch_tile)
    if num_tiles <= 1:
        # Tiny problem: single invocation, whole-array VMEM blocks, no grid /
        # pipeline machinery, no double-buffering of weights.
        vmem = pltpu.MemorySpace.VMEM
        out_p = pl.pallas_call(
            mlp_kernel,
            out_shape=out_shape,
            in_specs=[pl.BlockSpec(memory_space=vmem) for _ in operands],
            out_specs=pl.BlockSpec(memory_space=vmem),
        )(*operands)
    else:
        # Stream the batch axis; weights/biases stay VMEM-resident across the
        # grid (index_map pinned to block (0, 0)); batch axis is "parallel" so
        # both v7x TensorCores are used.
        def batch_map(i):
            return (i, 0)

        def resident_map(i):
            return (0, 0)

        in_specs = [pl.BlockSpec((batch_tile, obs_p), batch_map)]
        for i in (1, 2, 3, 4):
            in_specs.append(pl.BlockSpec(p[f"w{i}"].shape, resident_map))
            in_specs.append(pl.BlockSpec(p[f"b{i}"].shape, resident_map))

        out_p = pl.pallas_call(
            mlp_kernel,
            out_shape=out_shape,
            grid=(num_tiles,),
            in_specs=in_specs,
            out_specs=pl.BlockSpec((batch_tile, act_p), batch_map),
            compiler_params=pltpu.CompilerParams(
                dimension_semantics=("parallel",),
                vmem_limit_bytes=32 * 1024 * 1024),
        )(*operands)

    return out_p[:, :n_actions]


def reference_forward(x, params):
    """Exact f32 forward -- same math as the PyTorch module."""
    h = x
    for i in (1, 2, 3):
        h = jnp.maximum(h @ params[f"w{i}"] + params[f"b{i}"], 0.0)
    return h @ params["w4"] + params["b4"]


def reference_forward_mixed(x, params, compute_dtype=jnp.bfloat16):
    """Pure-JAX reference that mimics the kernel's bf16-matmul / f32-accumulate
    numerics (tight correctness check)."""
    p = prepare_params(params, compute_dtype)
    n_actions = params["w4"].shape[1]
    obs_p = p["w1"].shape[0]
    h = jnp.pad(x, ((0, 0), (0, obs_p - x.shape[1]))).astype(compute_dtype)
    for i in (1, 2, 3):
        a = jnp.dot(h, p[f"w{i}"],
                    preferred_element_type=jnp.float32) + p[f"b{i}"]
        h = jnp.maximum(a, 0.0).astype(compute_dtype)
    y = jnp.dot(h, p["w4"], preferred_element_type=jnp.float32) + p["b4"]
    return y[:, :n_actions]


if __name__ == "__main__":
    obs_size, hidden_size, n_actions = 16, 32, 8

    key = jax.random.PRNGKey(0)
    key, kp = jax.random.split(key)
    params = init_params(kp, obs_size, hidden_size, n_actions)

    # Small RL-style batch -> single-block (no grid) path.
    key, kx = jax.random.split(key)
    x_small = jax.random.normal(kx, (16, obs_size), jnp.float32)
    out_small = jax.block_until_ready(net_forward(x_small, params))

    # Larger batch -> batch-tiled path with resident weights + parallel grid.
    key, kx = jax.random.split(key)
    x_big = jax.random.normal(kx, (512, obs_size), jnp.float32)
    out_big = jax.block_until_ready(net_forward(x_big, params, batch_tile=256))

    for x, out in ((x_small, out_small), (x_big, out_big)):
        assert out.shape == (x.shape[0], n_actions)
        ref_mixed = reference_forward_mixed(x, params)
        ref_f32 = reference_forward(x, params)
        assert jnp.allclose(out, ref_mixed, atol=1e-3, rtol=1e-3), \
            "mismatch vs. mixed-precision reference"
        assert jnp.allclose(out, ref_f32, atol=7e-2, rtol=7e-2), \
            "mismatch vs. f32 reference"

    print("KERNEL_OK")
</pallas_src>

<mosaic_0001>
module attributes {stable_mosaic.version = 11 : i64} {
  func.func @mlp_kernel(%arg0: memref<16x128xbf16, #tpu.memory_space<vmem>>, %arg1: memref<128x128xbf16, #tpu.memory_space<vmem>>, %arg2: memref<1x128xf32, #tpu.memory_space<vmem>>, %arg3: memref<128x128xbf16, #tpu.memory_space<vmem>>, %arg4: memref<1x128xf32, #tpu.memory_space<vmem>>, %arg5: memref<128x128xbf16, #tpu.memory_space<vmem>>, %arg6: memref<1x128xf32, #tpu.memory_space<vmem>>, %arg7: memref<128x128xbf16, #tpu.memory_space<vmem>>, %arg8: memref<1x128xf32, #tpu.memory_space<vmem>>, %arg9: memref<16x128xf32, #tpu.memory_space<vmem>>) attributes {dimension_semantics = [], scalar_prefetch = 0 : i64, scratch_operands = 0 : i64, tpu.core_type = #tpu.core_type<tc>} {
    %c0 = arith.constant 0 : index
    %c0_0 = arith.constant 0 : index
    %0 = vector.load %arg0[%c0, %c0_0] : memref<16x128xbf16, #tpu.memory_space<vmem>>, vector<16x128xbf16>
    %c0_1 = arith.constant 0 : index
    %c0_2 = arith.constant 0 : index
    %1 = vector.load %arg1[%c0_1, %c0_2] : memref<128x128xbf16, #tpu.memory_space<vmem>>, vector<128x128xbf16>
    %cst = arith.constant dense<0.000000e+00> : vector<16x128xf32>
    %2 = tpu.matmul %0, %1, %cst {dimension_numbers = #tpu.dot_dimension_numbers<[1], [0], [0], [1], [0, 0, 1, 1], [], []>} : vector<16x128xbf16>, vector<128x128xbf16>, vector<16x128xf32> -> vector<16x128xf32>
    %c0_3 = arith.constant 0 : index
    %c0_4 = arith.constant 0 : index
    %3 = vector.load %arg2[%c0_3, %c0_4] : memref<1x128xf32, #tpu.memory_space<vmem>>, vector<1x128xf32>
    %4 = vector.broadcast %3 : vector<1x128xf32> to vector<16x128xf32>
    %5 = arith.addf %2, %4 : vector<16x128xf32>
    %cst_5 = arith.constant 0.000000e+00 : f32
    %6 = vector.broadcast %cst_5 : f32 to vector<16x128xf32>
    %7 = arith.maximumf %5, %6 : vector<16x128xf32>
    %8 = arith.truncf %7 : vector<16x128xf32> to vector<16x128xbf16>
    %c0_6 = arith.constant 0 : index
    %c0_7 = arith.constant 0 : index
    %9 = vector.load %arg3[%c0_6, %c0_7] : memref<128x128xbf16, #tpu.memory_space<vmem>>, vector<128x128xbf16>
    %cst_8 = arith.constant dense<0.000000e+00> : vector<16x128xf32>
    %10 = tpu.matmul %8, %9, %cst_8 {dimension_numbers = #tpu.dot_dimension_numbers<[1], [0], [0], [1], [0, 0, 1, 1], [], []>} : vector<16x128xbf16>, vector<128x128xbf16>, vector<16x128xf32> -> vector<16x128xf32>
    %c0_9 = arith.constant 0 : index
    %c0_10 = arith.constant 0 : index
    %11 = vector.load %arg4[%c0_9, %c0_10] : memref<1x128xf32, #tpu.memory_space<vmem>>, vector<1x128xf32>
    %12 = vector.broadcast %11 : vector<1x128xf32> to vector<16x128xf32>
    %13 = arith.addf %10, %12 : vector<16x128xf32>
    %cst_11 = arith.constant 0.000000e+00 : f32
    %14 = vector.broadcast %cst_11 : f32 to vector<16x128xf32>
    %15 = arith.maximumf %13, %14 : vector<16x128xf32>
    %16 = arith.truncf %15 : vector<16x128xf32> to vector<16x128xbf16>
    %c0_12 = arith.constant 0 : index
    %c0_13 = arith.constant 0 : index
    %17 = vector.load %arg5[%c0_12, %c0_13] : memref<128x128xbf16, #tpu.memory_space<vmem>>, vector<128x128xbf16>
    %cst_14 = arith.constant dense<0.000000e+00> : vector<16x128xf32>
    %18 = tpu.matmul %16, %17, %cst_14 {dimension_numbers = #tpu.dot_dimension_numbers<[1], [0], [0], [1], [0, 0, 1, 1], [], []>} : vector<16x128xbf16>, vector<128x128xbf16>, vector<16x128xf32> -> vector<16x128xf32>
    %c0_15 = arith.constant 0 : index
    %c0_16 = arith.constant 0 : index
    %19 = vector.load %arg6[%c0_15, %c0_16] : memref<1x128xf32, #tpu.memory_space<vmem>>, vector<1x128xf32>
    %20 = vector.broadcast %19 : vector<1x128xf32> to vector<16x128xf32>
    %21 = arith.addf %18, %20 : vector<16x128xf32>
    %cst_17 = arith.constant 0.000000e+00 : f32
    %22 = vector.broadcast %cst_17 : f32 to vector<16x128xf32>
    %23 = arith.maximumf %21, %22 : vector<16x128xf32>
    %24 = arith.truncf %23 : vector<16x128xf32> to vector<16x128xbf16>
    %c0_18 = arith.constant 0 : index
    %c0_19 = arith.constant 0 : index
    %25 = vector.load %arg7[%c0_18, %c0_19] : memref<128x128xbf16, #tpu.memory_space<vmem>>, vector<128x128xbf16>
    %cst_20 = arith.constant dense<0.000000e+00> : vector<16x128xf32>
    %26 = tpu.matmul %24, %25, %cst_20 {dimension_numbers = #tpu.dot_dimension_numbers<[1], [0], [0], [1], [0, 0, 1, 1], [], []>} : vector<16x128xbf16>, vector<128x128xbf16>, vector<16x128xf32> -> vector<16x128xf32>
    %c0_21 = arith.constant 0 : index
    %c0_22 = arith.constant 0 : index
    %27 = vector.load %arg8[%c0_21, %c0_22] : memref<1x128xf32, #tpu.memory_space<vmem>>, vector<1x128xf32>
    %28 = vector.broadcast %27 : vector<1x128xf32> to vector<16x128xf32>
    %29 = arith.addf %26, %28 : vector<16x128xf32>
    %c0_23 = arith.constant 0 : index
    %c0_24 = arith.constant 0 : index
    %30 = vector.load %arg9[%c0_23, %c0_24] : memref<16x128xf32, #tpu.memory_space<vmem>>, vector<16x128xf32>
    tpu.vector_store %arg9[%c0_23, %c0_24], %29 {strides = array<i32>} : memref<16x128xf32, #tpu.memory_space<vmem>>, vector<16x128xf32>,
    return
  }
}

</mosaic_0001>

<bundles_post_ra>
// kernel: tpu_custom_call.1
= control target key start
LH: loop header
LB: loop body
LE: loop exit
PB: predicated region body
PF: predicated region fallthrough
CT: control target
= control target key end

     0   :  { %14 = vsyncpa [#allocation3], 0  ;;  %s900_s0 = inlined_call_operand.hbm [shape: bf16[16,128], index: 0, kind: input, shape index: {}]   ;;  %s901_s1 = inlined_call_operand.hbm [shape: bf16[128,128], index: 1, kind: input, shape index: {}]   ;;  %s902_s2 = inlined_call_operand.vmem [shape: f32[1,128], index: 2, kind: input, shape index: {}]   ;;  %s903_s3 = inlined_call_operand.hbm [shape: bf16[128,128], index: 3, kind: input, shape index: {}]   ;;  %s904_s4 = inlined_call_operand.vmem [shape: f32[1,128], index: 4, kind: input, shape index: {}]   ;;  %s905_s5 = inlined_call_operand.hbm [shape: bf16[128,128], index: 5, kind: input, shape index: {}]   ;;  %s906_s6 = inlined_call_operand.vmem [shape: f32[1,128], index: 6, kind: input, shape index: {}]   ;;  %s907_s7 = inlined_call_operand.hbm [shape: bf16[128,128], index: 7, kind: input, shape index: {}]   ;;  %s908_s8 = inlined_call_operand.vmem [shape: f32[1,128], index: 8, kind: input, shape index: {}]   ;;  %s909_s9 = inlined_call_operand.hbm [shape: f32[16,128], index: 9, kind: output, shape index: {}]  }
   0x1   :  { %15 = vsyncpa [#allocation6], 0 }
   0x2   :  { %16 = vsyncpa [#allocation9], 0 }
   0x3   :  { %17 = vsyncpa [#allocation4], 0  ;;  %s35_s11 = sshll.u32 %s901_s1, 4  ;;  %s810_s12 = smov [#allocation5]   ;;  %s36_s11 = int_to_ptr.hbm [resolvable:$true] %s35_s11 }
   0x4   :  { %s37_s13 = sshll.u32 %s810_s12, 4  ;;  %s65_s16 = sshll.u32 %s905_s5, 4  ;;  %s38_s13 = int_to_ptr.vmem [resolvable:$true] %s37_s13  ;;  %s66_s16 = int_to_ptr.hbm [resolvable:$true] %s65_s16 }
   0x5   :  { %s811_s17 = smov 64   ;;  %s812_s18 = smov 4  }
   0x6   :  { %43 = dma.hbm_to_vmem [thread:$0]  %s36_s11, 1024, %s38_s13, [#allocation6], %s811_s17, %s811_s17, %s812_s18  }
   0x7   :  { %s813_s19 = smov [#allocation8]   ;;  %s22_s23 = sshll.u32 %s900_s0, 4  ;;  %s23_s23 = int_to_ptr.hbm [resolvable:$true] %s22_s23 }
   0x8   :  { %s67_s20 = sshll.u32 %s813_s19, 4  ;;  %s50_s25 = sshll.u32 %s903_s3, 4  ;;  %s68_s20 = int_to_ptr.vmem [resolvable:$true] %s67_s20  ;;  %s51_s25 = int_to_ptr.hbm [resolvable:$true] %s50_s25 }
   0x9   :  { %73 = dma.hbm_to_vmem [thread:$0]  %s66_s16, 1024, %s68_s20, [#allocation9], %s811_s17, %s811_s17, %s812_s18  }
   0xa   :  { %s814_s26 = smov [#allocation2]   ;;  %s815_s5 = smov [#allocation7]  }
   0xb   :  { %s24_s27 = sshll.u32 %s814_s26, 4  ;;  %s52_s28 = sshll.u32 %s815_s5, 4  ;;  %s25_s27 = int_to_ptr.vmem [resolvable:$true] %s24_s27  ;;  %s53_s28 = int_to_ptr.vmem [resolvable:$true] %s52_s28 }
   0xc   :  { %30 = dma.hbm_to_vmem [thread:$0]  %s23_s23, 128, %s25_s27, [#allocation3], %s811_s17, %s811_s17, %s812_s18  }
   0xd   :  { %s80_s10 = sshll.u32 %s907_s7, 4  ;;  %s816_s0 = smov [#allocation10]   ;;  %s81_s10 = int_to_ptr.hbm [resolvable:$true] %s80_s10 }
   0xe   :  { %58 = dma.hbm_to_vmem [thread:$0]  %s51_s25, 1024, %s53_s28, [#allocation6], %s811_s17, %s811_s17, %s812_s18  }
   0xf   :  { %s82_s11 = sshll.u32 %s816_s0, 4  ;;  %s83_s11 = int_to_ptr.vmem [resolvable:$true] %s82_s11 }
  0x10   :  { %88 = dma.hbm_to_vmem [thread:$0]  %s81_s10, 1024, %s83_s11, [#allocation9], %s811_s17, %s811_s17, %s812_s18  }
  0x11   :  { %802 = dma.done.wait [#allocation3], 128  }
  0x12   :  { %803 = vsyncadd [#allocation3], 4294967168 }
  0x13   :  { %804 = dma.done.wait [#allocation6], 2048  }
  0x14   :  { %805 = vsyncadd [#allocation6], 4294965248 }
  0x15   :  { %806 = dma.done.wait [#allocation9], 2048  }
  0x16   :  { %807 = vsyncadd [#allocation9], 4294965248  ;;  %v619_v0 = vld [vmem:[#allocation5 + $0x38] sm:$0xff]  ;;  %v618_v1 = vld [vmem:[#allocation5 + $0x30] sm:$0xff]  ;;  %s817_s16 = smov [#allocation11]   ;;  %s818_s20 = smov 128  }
  0x17   :  { %187 = vmatpush.bf16.msra.mxu0 %v619_v0  ;;  %v627_v2 = vld [vmem:[#allocation7 + $0x38] sm:$0xff]  ;;  %v626_v3 = vld [vmem:[#allocation7 + $0x30] sm:$0xff]  ;;  %v617_v4 = vld [vmem:[#allocation5 + $0x28] sm:$0xff]  ;;  %s462_s17 = sshll.u32 %s817_s16, 4  ;;  %s819_s21 = smov 8   ;;  %s463_s17 = int_to_ptr.vmem [resolvable:$true] %s462_s17 }
  0x18   :  { %272 = vmatpush.bf16.msra.mxu1 %v627_v2  ;;  %v625_v5 = vld [vmem:[#allocation7 + $0x28] sm:$0xff]  ;;  %v616_v6 = vld [vmem:[#allocation5 + $0x20] sm:$0xff]  ;;  %v615_v8 = vld [vmem:[#allocation5 + $0x18] sm:$0xff] }
  0x19   :  { %v624_v7 = vld [vmem:[#allocation7 + $0x20] sm:$0xff]  ;;  %v614_v9 = vld [vmem:[#allocation5 + $0x10] sm:$0xff]  ;;  %v613_v10 = vld [vmem:[#allocation5 + $0x8] sm:$0xff] }
  0x1a   :  { %v612_v11 = vld [vmem:[#allocation5] sm:$0xff]  ;;  %v611_v12 = vld [vmem:[#allocation2] sm:$0xff]  ;;  %v622_v14 = vld [vmem:[#allocation7 + $0x10] sm:$0xff] }
  0x1b   :  { %188 = vmatpush.bf16.msra.mxu0 %v618_v1  ;;  %v623_v13 = vld [vmem:[#allocation7 + $0x18] sm:$0xff]  ;;  %v621_v15 = vld [vmem:[#allocation7 + $0x8] sm:$0xff]  ;;  %v620_v16 = vld [vmem:[#allocation7] sm:$0xff] }
  0x1c   :  { %273 = vmatpush.bf16.msra.mxu1 %v626_v3  ;;  %v635_v17 = vld [vmem:[#allocation8 + $0x38] sm:$0xff]  ;;  %v634_v18 = vld [vmem:[#allocation8 + $0x30] sm:$0xff]  ;;  %v633_v19 = vld [vmem:[#allocation8 + $0x28] sm:$0xff] }
  0x1d   :  { %357 = vmatpush.bf16.msra.mxu2 %v635_v17  ;;  %v632_v20 = vld [vmem:[#allocation8 + $0x20] sm:$0xff]  ;;  %v654_v22 = vld [vmem:[%s902_s2] ss:$0 sm:$0xff]  ;;  %v630_v30 = vld [vmem:[#allocation8 + $0x10] sm:$0xff] }
  0x1e   :  { %v631_v29 = vld [vmem:[#allocation8 + $0x18] sm:$0xff]  ;;  %v629_v31 = vld [vmem:[#allocation8 + $0x8] sm:$0xff]  ;;  %v628_v32 = vld [vmem:[#allocation8] sm:$0xff] }
  0x1f   :  { %189 = vmatpush.bf16.msra.mxu0 %v617_v4  ;;  %v643_v33 = vld [vmem:[#allocation10 + $0x38] sm:$0xff]  ;;  %v642_v34 = vld [vmem:[#allocation10 + $0x30] sm:$0xff]  ;;  %v641_v35 = vld [vmem:[#allocation10 + $0x28] sm:$0xff] }
  0x20   :  { %274 = vmatpush.bf16.msra.mxu1 %v625_v5  ;;  %442 = vmatpush.bf16.msra.mxu3 %v643_v33  ;;  %v640_v36 = vld [vmem:[#allocation10 + $0x20] sm:$0xff]  ;;  %v655_v38 = vld [vmem:[%s904_s4] ss:$0 sm:$0xff]  ;;  %v638_v46 = vld [vmem:[#allocation10 + $0x10] sm:$0xff] }
  0x21   :  { %358 = vmatpush.bf16.msra.mxu2 %v634_v18  ;;  %v639_v45 = vld [vmem:[#allocation10 + $0x18] sm:$0xff]  ;;  %v637_v47 = vld [vmem:[#allocation10 + $0x8] sm:$0xff]  ;;  %v636_v48 = vld [vmem:[#allocation10] sm:$0xff] }
  0x22   :  { %v656_v50 = vld [vmem:[%s906_s6] ss:$0 sm:$0xff]  ;;  %s464_s6 = sshll.u32 %s909_s9, 4  ;;  %s465_s6 = int_to_ptr.hbm [resolvable:$true] %s464_s6 }
  0x23   :  { %190 = vmatpush.bf16.msra.mxu0 %v616_v6  ;;  %v657_v57 = vld [vmem:[%s908_s8] ss:$0 sm:$0xff] }
  0x24   :  { %275 = vmatpush.bf16.msra.mxu1 %v624_v7  ;;  %443 = vmatpush.bf16.msra.mxu3 %v642_v34 }
  0x25   :  { %359 = vmatpush.bf16.msra.mxu2 %v633_v19 }
  0x27   :  { %191 = vmatpush.bf16.msra.mxu0 %v615_v8 }
  0x28   :  { %276 = vmatpush.bf16.msra.mxu1 %v623_v13  ;;  %444 = vmatpush.bf16.msra.mxu3 %v641_v35 }
  0x29   :  { %360 = vmatpush.bf16.msra.mxu2 %v632_v20 }
  0x2b   :  { %192 = vmatpush.bf16.msra.mxu0 %v614_v9 }
  0x2c   :  { %277 = vmatpush.bf16.msra.mxu1 %v622_v14  ;;  %445 = vmatpush.bf16.msra.mxu3 %v640_v36 }
  0x2d   :  { %361 = vmatpush.bf16.msra.mxu2 %v631_v29 }
  0x2f   :  { %193 = vmatpush.bf16.msra.mxu0 %v613_v10 }
  0x30   :  { %278 = vmatpush.bf16.msra.mxu1 %v621_v15  ;;  %446 = vmatpush.bf16.msra.mxu3 %v639_v45 }
  0x31   :  { %362 = vmatpush.bf16.msra.mxu2 %v630_v30 }
  0x33   :  { %194 = vmatpush.bf16.msra.mxu0 %v612_v11 }
  0x34   :  { %279 = vmatpush.bf16.msra.mxu1 %v620_v16  ;;  %447 = vmatpush.bf16.msra.mxu3 %v638_v46 }
  0x35   :  { %363 = vmatpush.bf16.msra.mxu2 %v629_v31 }
  0x36   :  { %195 = vmatmul.bf16.vlgmr.msra.gmra.mxu0 %v611_v12 }
  0x38   :  { %448 = vmatpush.bf16.msra.mxu3 %v637_v47 }
  0x39   :  { %364 = vmatpush.bf16.msra.mxu2 %v628_v32 }
  0x3c   :  { %449 = vmatpush.bf16.msra.mxu3 %v636_v48 }
  0xb3   :  { %v196_v21 = vpop.f32.mrf.mxu0 }
  0xb4   :  { %v197_v23 = vadd.f32 %v654_v22, %v196_v21 }
  0xb6   :  { %v201_v26 = vmax.f32 %v197_v23, 0.0 }
  0xbb   :  { %v198_v24 = vpop.f32.mrf.mxu0 }
  0xbc   :  { %v199_v25 = vadd.f32 %v654_v22, %v198_v24 }
  0xbe   :  { %v202_v27 = vmax.f32 %v199_v25, 0.0 }
  0xc0   :  { %v203_v28 = vpack.c.bf16 %v202_v27, %v201_v26 }
  0xc2   :  { %280 = vmatmul.bf16.vlgmr.msra.gmra.mxu1 %v203_v28 }
 0x13f   :  { %v281_v37 = vpop.f32.mrf.mxu1 }
 0x140   :  { %v282_v39 = vadd.f32 %v655_v38, %v281_v37 }
 0x142   :  { %v286_v42 = vmax.f32 %v282_v39, 0.0 }
 0x147   :  { %v283_v40 = vpop.f32.mrf.mxu1 }
 0x148   :  { %v284_v41 = vadd.f32 %v655_v38, %v283_v40 }
 0x14a   :  { %v287_v43 = vmax.f32 %v284_v41, 0.0 }
 0x14c   :  { %v288_v44 = vpack.c.bf16 %v287_v43, %v286_v42 }
 0x14e   :  { %365 = vmatmul.bf16.vlgmr.msra.gmra.mxu2 %v288_v44 }
 0x1d1   :  { %v366_v49 = vpop.f32.mrf.mxu2 }
 0x1d2   :  { %v367_v51 = vadd.f32 %v656_v50, %v366_v49 }
 0x1d4   :  { %v371_v54 = vmax.f32 %v367_v51, 0.0 }
 0x1d9   :  { %v368_v52 = vpop.f32.mrf.mxu2 }
 0x1da   :  { %v369_v53 = vadd.f32 %v656_v50, %v368_v52 }
 0x1dc   :  { %v372_v55 = vmax.f32 %v369_v53, 0.0 }
 0x1de   :  { %v373_v56 = vpack.c.bf16 %v372_v55, %v371_v54 }
 0x1e0   :  { %450 = vmatmul.bf16.vlgmr.msra.gmra.mxu3 %v373_v56 }
 0x263   :  { %v451_v58 = vpop.f32.mrf.mxu3 }
 0x264   :  { %v452_v59 = vadd.f32 %v657_v57, %v451_v58 }
 0x266   :  { %456 = vst [vmem:[#allocation11] sm:$0xff] %v452_v59 }
 0x26b   :  { %v453_v60 = vpop.f32.mrf.mxu3 }
 0x26c   :  { %v454_v61 = vadd.f32 %v657_v57, %v453_v60 }
 0x26e   :  { %457 = vst [vmem:[#allocation11 + $0x8] sm:$0xff] %v454_v61 }
 0x26f   :  { %470 = dma.vmem_to_hbm [thread:$0]  %s463_s17, 256, %s465_s6, [#allocation4], %s818_s20, %s818_s20, %s819_s21  }
 0x270   :  { %808 = dma.done.wait [#allocation4], 256  }
 0x271   :  { %809 = vsyncadd [#allocation4], 4294967040 }
 0x272   :  { %475 = vsyncpa [#allocation3], 1 }
 0x273   :  { %476 = vsyncpa [#allocation6], 1 }
 0x274   :  { %477 = vsyncpa [#allocation9], 1 }
 0x275   :  { %478 = vsyncpa [#allocation4], 1 }

</bundles_post_ra>
